<compile_context>
chip_gen: v7x
topology: tpu7x:2x2x1
jax: 0.10.0
libtpu: 0.0.40
codegen_flags: <defaults>
</compile_context>

<pallas_src>
import jax
import jax.numpy as jnp
from jax.experimental import pallas as pl
from jax.experimental.pallas import tpu as pltpu


# ~2 MiB per block: with double-buffered input + output (4 live buffers) we
# stay far under the 32 MiB scoped-VMEM default on v6e/v7x.
_TARGET_BLOCK_BYTES = 2 * 1024 * 1024
_LANE_CHOICES = (4096, 2048, 1024, 512, 256, 128)


def _make_leaky_relu_kernel(leakiness):
    leak = float(leakiness)

    def kernel(x_ref, o_ref):
        x = x_ref[...]
        # Upcast inside the kernel: data is already in vregs, so this costs no
        # extra HBM traffic and keeps the math in f32 even on v5e (no native
        # bf16 VPU).  For f32 inputs it is a no-op.
        xf = x.astype(jnp.float32)
        y = jnp.where(xf >= 0, xf, jnp.float32(leak) * xf)
        o_ref[...] = y.astype(o_ref.dtype)

    return kernel


def _lane_layout(n):
    """Pick a lane-dense last dim (multiple of 128) and the tail padding."""
    for lanes in _LANE_CHOICES:
        if n % lanes == 0:
            return lanes, 0
    lanes = 128
    return lanes, (-n) % lanes


class NetworkBase:
    """
    JAX/Pallas analogue of the abstract NetworkBase module.

    Stores the same global network parameters and provides the elementwise
    leaky activation (parameterized by `leakiness`) as a Pallas TPU kernel.
    """

    def __init__(self, cfg, name="network_base"):
        model_cfg = cfg["modules"][name]
        self.D = model_cfg.get("D", 3)
        self.num_input = model_cfg.get("num_input", 1)
        self.allow_bias = model_cfg.get("allow_bias", True)
        self.leakiness = model_cfg.get("leakiness", 0.0)

        self._kernel = _make_leaky_relu_kernel(self.leakiness)

    def leaky_relu(self, x, *, use_pallas=None):
        """Elementwise LeakyReLU(x, negative_slope=self.leakiness) on TPU."""
        if not jnp.issubdtype(x.dtype, jnp.floating):
            raise TypeError(f"leaky_relu expects a floating dtype, got {x.dtype}")

        n = x.size
        nbytes = n * x.dtype.itemsize
        if use_pallas is None:
            # Kernel-launch / grid-step overhead dwarfs the math for tiny
            # tensors; only dispatch to Pallas once there is real data.
            use_pallas = nbytes >= (1 << 20)
        if not use_pallas:
            return jnp.where(x >= 0, x, jnp.asarray(self.leakiness, x.dtype) * x)

        orig_shape = x.shape

        # Flatten to a lane-dense 2-D slab (last dim a large multiple of 128).
        lanes, pad = _lane_layout(n)
        flat = x.reshape(-1)
        if pad:
            # TODO(synk): tail padding costs one extra copy; only hit when the
            # element count is not a multiple of 128.
            flat = jnp.pad(flat, (0, pad))
        rows = (n + pad) // lanes
        x2d = flat.reshape(rows, lanes)

        # Row-tile sized for ~_TARGET_BLOCK_BYTES per block, multiple of 8.
        tr = max(8, (_TARGET_BLOCK_BYTES // (lanes * x.dtype.itemsize)) // 8 * 8)
        if tr >= rows:
            tr = rows  # full extent -> satisfies the (8,128) rule even if rows<8
        grid = (pl.cdiv(rows, tr),)

        out = pl.pallas_call(
            self._kernel,
            out_shape=jax.ShapeDtypeStruct((rows, lanes), x.dtype),
            grid=grid,
            in_specs=[pl.BlockSpec((tr, lanes), lambda i: (i, 0))],
            out_specs=pl.BlockSpec((tr, lanes), lambda i: (i, 0)),
            compiler_params=pltpu.CompilerParams(
                dimension_semantics=("parallel",)),
        )(x2d)

        out = out.reshape(-1)
        if pad:
            out = out[:n]
        return out.reshape(orig_shape)

    def forward(self, input):
        # Abstract in the reference module.
        raise NotImplementedError

    __call__ = leaky_relu  # convenience: the only concrete compute path


def _reference(x, leakiness):
    # Matches the kernel's arithmetic: compute in f32, cast back to x.dtype.
    xf = x.astype(jnp.float32)
    return jnp.where(xf >= 0, xf, jnp.float32(leakiness) * xf).astype(x.dtype)


if __name__ == "__main__":
    cfg = {
        "modules": {
            "network_base": {
                "D": 2,
                "num_input": 4,
                "allow_bias": True,
                "leakiness": 0.1,
            }
        }
    }
    net = NetworkBase(cfg)

    key = jax.random.PRNGKey(0)
    k0, k1, k2 = jax.random.split(key, 3)

    # 1) Canonical small NCHW input (num_input=4 channels, D=2 spatial dims).
    #    Force the Pallas path so the kernel itself is exercised even though
    #    the tensor is tiny.
    x0 = jax.random.normal(k0, (2, 4, 16, 16), dtype=jnp.float32)
    y0 = jax.block_until_ready(net.leaky_relu(x0, use_pallas=True))
    assert y0.shape == x0.shape and y0.dtype == x0.dtype
    assert jnp.allclose(y0, _reference(x0, net.leakiness), atol=1e-6)

    # 2) bf16 input whose element count is not a multiple of 128 -> exercises
    #    the tail-padding path and the in-kernel upcast/downcast.
    x1 = jax.random.normal(k1, (2, 4, 33, 40), dtype=jnp.bfloat16)
    y1 = jax.block_until_ready(net.leaky_relu(x1, use_pallas=True))
    assert y1.shape == x1.shape and y1.dtype == x1.dtype
    assert jnp.allclose(y1.astype(jnp.float32),
                        _reference(x1, net.leakiness).astype(jnp.float32),
                        atol=1e-2)

    # 3) A slightly larger f32 tensor that produces a multi-step grid with a
    #    partially-masked final block (rows not a multiple of the row tile).
    x2 = jax.random.normal(k2, (4, 8, 128, 160), dtype=jnp.float32)
    y2 = jax.block_until_ready(net.leaky_relu(x2))  # auto-dispatch -> Pallas
    assert y2.shape == x2.shape and y2.dtype == x2.dtype
    assert jnp.allclose(y2, _reference(x2, net.leakiness), atol=1e-6)

    print("KERNEL_OK")
</pallas_src>

<mosaic_0001>
module attributes {stable_mosaic.version = 11 : i64} {
  func.func @kernel(%arg0: i32, %arg1: memref<1x2048xf32, #tpu.memory_space<vmem>>, %arg2: memref<1x2048xf32, #tpu.memory_space<vmem>>) attributes {dimension_semantics = [#tpu.dimension_semantics<parallel>], iteration_bounds = array<i64: 1>, scalar_prefetch = 0 : i64, scratch_operands = 0 : i64, tpu.core_type = #tpu.core_type<tc>, window_params = [{transform_indices = @transform_0, window_bounds = array<i64: 1, 2048>}, {transform_indices = @transform_1, window_bounds = array<i64: 1, 2048>}]} {
    %c0 = arith.constant 0 : index
    %c0_0 = arith.constant 0 : index
    %0 = vector.load %arg1[%c0, %c0_0] : memref<1x2048xf32, #tpu.memory_space<vmem>>, vector<1x2048xf32>
    %cst = arith.constant 0.000000e+00 : f32
    %1 = vector.broadcast %cst : f32 to vector<1x2048xf32>
    %2 = arith.cmpf oge, %0, %1 : vector<1x2048xf32>
    %cst_1 = arith.constant 1.000000e-01 : f32
    %3 = vector.broadcast %cst_1 : f32 to vector<1x2048xf32>
    %4 = arith.mulf %3, %0 : vector<1x2048xf32>
    %5 = arith.select %2, %0, %4 : vector<1x2048xi1>, vector<1x2048xf32>
    %c0_2 = arith.constant 0 : index
    %c0_3 = arith.constant 0 : index
    %6 = vector.load %arg2[%c0_2, %c0_3] : memref<1x2048xf32, #tpu.memory_space<vmem>>, vector<1x2048xf32>
    tpu.vector_store %arg2[%c0_2, %c0_3], %5 {strides = array<i32>} : memref<1x2048xf32, #tpu.memory_space<vmem>>, vector<1x2048xf32>,
    return
  }
  func.func @transform_0(%arg0: i32) -> (i32, i32) {
    %c0_i32 = arith.constant 0 : i32
    %c0_i32_0 = arith.constant 0 : i32
    return %arg0, %c0_i32 : i32, i32
  }
  func.func @transform_1(%arg0: i32) -> (i32, i32) {
    %c0_i32 = arith.constant 0 : i32
    %c0_i32_0 = arith.constant 0 : i32
    return %arg0, %c0_i32 : i32, i32
  }
}

</mosaic_0001>

<bundles_post_ra>
// kernel: tpu_custom_call.1
= control target key start
LH: loop header
LB: loop body
LE: loop exit
PB: predicated region body
PF: predicated region fallthrough
CT: control target
= control target key end

     0   :  { %6 = vsyncpa [#allocation3], 0  ;;  %s132_s0 = inlined_call_operand.hbm [shape: f32[1,2048], index: 0, kind: input, shape index: {}]   ;;  %s133_s1 = inlined_call_operand.hbm [shape: f32[1,2048], index: 1, kind: output, shape index: {}]  }
   0x1   :  { %7 = vsyncpa [#allocation4], 0  ;;  %s96_s6 = smov [#allocation2]   ;;  %s48_s10 = scalar_lea.hbm %s132_s0, 256 }
   0x2   :  { %s14_s7 = sshll.u32 %s96_s6, 4  ;;  %p49_p0 = scmp.ne.s32.totalorder %s132_s0, %s48_s10  ;;  %s15_s7 = int_to_ptr.vmem [resolvable:$true] %s14_s7 }
   0x3   :  { %p52_p1 = scmp.lt.u32.totalorder %s48_s10, %s132_s0 }
   0x5   :  { %p54_p2 = pnand %p52_p1, %p49_p0 }
   0x7   :  { %57 = shalt.err (!%p54_p2)
}
   0x8   :  { %s58_s15 = scalar_lea.vmem %s15_s7, 256  ;;  %p63_p4 = scmp.lt.s32.totalorder %s15_s7, %s15_s7 }
   0x9   :  { %p59_p3 = scmp.ne.s32.totalorder %s15_s7, %s58_s15  ;;  %p64_p5 = scmp.lt.s32.totalorder %s58_s15, %s58_s15 }
   0xb   :  { %p65_p6 = por %p64_p5, %p63_p4 }
   0xd   :  { %p66_p7 = pnand %p65_p6, %p59_p3 }
   0xf   :  { %69 = shalt.err (!%p66_p7)
}
  0x10   :  { %17 = dma.hbm_to_vmem [thread:$0]  %s132_s0, 256, %s15_s7, [#allocation3]  }
  0x11   :  { %92 = dma.done.wait [#allocation3], 256  }
  0x12   :  { %93 = vsyncadd [#allocation3], 4294967040  ;;  %s97_s18 = smov [#allocation5]   ;;  %v21_v0 = vld [vmem:[#allocation2] sm:$0xff]  ;;  %v22_v1 = vld [vmem:[#allocation2 + $0x8] sm:$0xff] }
  0x13   :  { %s37_s19 = sshll.u32 %s97_s18, 4  ;;  %vm23_vm0 = vcmp.ge.f32.partialorder %v21_v0, 0.0  ;;  %v25_v2 = vmul.f32 0.1, %v21_v0  ;;  %vm24_vm1 = vcmp.ge.f32.partialorder %v22_v1, 0.0  ;;  %s38_s19 = int_to_ptr.vmem [resolvable:$true] %s37_s19 }
  0x14   :  { %v26_v3 = vmul.f32 0.1, %v22_v1  ;;  %s70_s20 = scalar_lea.vmem %s38_s19, 256  ;;  %p75_p9 = scmp.lt.s32.totalorder %s38_s19, %s38_s19 }
  0x15   :  { %v27_v4 = vsel %vm23_vm0, %v21_v0, %v25_v2  ;;  %p71_p8 = scmp.ne.s32.totalorder %s38_s19, %s70_s20  ;;  %p76_p10 = scmp.lt.s32.totalorder %s70_s20, %s70_s20 }
  0x16   :  { %v28_v5 = vsel %vm24_vm1, %v22_v1, %v26_v3  ;;  %29 = vst [vmem:[#allocation5] sm:$0xff] %v27_v4 }
  0x17   :  { %30 = vst [vmem:[#allocation5 + $0x8] sm:$0xff] %v28_v5  ;;  %p77_p11 = por %p76_p10, %p75_p9 }
  0x19   :  { %p78_p12 = pnand %p77_p11, %p71_p8 }
  0x1b   :  { %81 = shalt.err (!%p78_p12)
}
  0x1c   :  { %s82_s22 = scalar_lea.hbm %s133_s1, 256 }
  0x1d   :  { %p83_p13 = scmp.ne.s32.totalorder %s133_s1, %s82_s22  ;;  %p86_p0 = scmp.lt.u32.totalorder %s82_s22, %s133_s1 }
  0x1f   :  { %p88_p1 = pnand %p86_p0, %p83_p13 }
  0x21   :  { %91 = shalt.err (!%p88_p1)
}
  0x22   :  { %40 = dma.vmem_to_hbm [thread:$0]  %s38_s19, 256, %s133_s1, [#allocation4]  }
  0x23   :  { %94 = dma.done.wait [#allocation4], 256  }
  0x24   :  { %95 = vsyncadd [#allocation4], 4294967040 }
  0x25   :  { %44 = vsyncpa [#allocation3], 1 }
  0x26   :  { %45 = vsyncpa [#allocation4], 1 }

</bundles_post_ra>
